<compile_context>
chip_gen: v6e
topology: v6e:2x2x1
jax: 0.10.0
libtpu: 0.0.40
codegen_flags: <defaults>
</compile_context>

<pallas_src>
import math

import jax
import jax.numpy as jnp
from jax import lax
from jax.experimental import pallas as pl
from jax.experimental.pallas import tpu as pltpu

LANES = 128
# Rows (of f32[?,128]) streamed per grid step across *all* tiled inputs.
# 12288 rows = 6 MiB single-copy -> ~12 MiB double-buffered, leaving headroom
# for the resident projection blocks under the 48 MiB scoped-VMEM request.
_STEP_ROW_BUDGET = 12288
_VMEM_LIMIT_BYTES = 48 * 1024 * 1024

# Fixed lane positions of every scalar inside the single (1, 128) output row.
_O_BPP, _O_MSE, _O_WMSE, _O_RD, _O_FEA, _O_WFEA, _O_CON, _O_WCON, _O_LOSS = range(9)


def _cdiv(a, b):
    return -(-a // b)


def _round_up(a, b):
    return _cdiv(a, b) * b


def _plan_grid(elem_counts):
    """Pick a shared reduction grid + per-tensor rows-per-block (lane-dense)."""
    rows = [max(1, _cdiv(int(s), LANES)) for s in elem_counts]
    grid = max(1, _cdiv(sum(rows), _STEP_ROW_BUDGET))
    # Sublane dim rounded to 32 keeps the block legal for f32/bf16/int8 tiling;
    # arrays are padded (with neutral values) up to grid * rows_per_block rows.
    rows_per_block = [_round_up(max(1, _cdiv(r, grid)), 32) for r in rows]
    return grid, rows_per_block


def _to_lane_tiles(x, neutral, rows_per_block, grid):
    """Flatten to a lane-dense (grid*rows_per_block, 128) tile stack."""
    flat = jnp.ravel(x)
    total = grid * rows_per_block * LANES
    if total != flat.size:
        flat = jnp.pad(flat, (0, total - flat.size), constant_values=neutral)
    return flat.reshape(grid * rows_per_block, LANES)


def _build_fused_kernel(*, n_lik, bpp_scale, mse_inv_n,
                        has_fea, fea_l1, fea_inv_n, has_inter, inter_inv_n,
                        has_con, con_hw, lambda_metric, lambda_fea):
    n_in = (n_lik + 2 + (2 if has_fea else 0) + (2 if has_inter else 0)
            + (2 if has_con else 0))

    def kernel(*refs):
        in_refs = refs[:n_in]
        out_ref = refs[n_in]            # single (1, 128) lane-dense scalar row
        scratch = refs[n_in + 1:]

        step = pl.program_id(0)
        last = pl.num_programs(0) - 1

        i = 0
        lik_refs = in_refs[i:i + n_lik]; i += n_lik
        xhat_ref, gt_ref = in_refs[i], in_refs[i + 1]; i += 2
        if has_fea:
            y_ref, ygt_ref = in_refs[i], in_refs[i + 1]; i += 2
            if has_inter:
                yi_ref, yigt_ref = in_refs[i], in_refs[i + 1]; i += 2
        if has_con:
            pa_ref, pb_ref = in_refs[i], in_refs[i + 1]; i += 2

        bpp_acc, mse_acc = scratch[0], scratch[1]
        s = 2
        if has_fea:
            fea_acc = scratch[s]; s += 1
        if has_con:
            pool_ref = scratch[s]; s += 1

        @pl.when(step == 0)
        def _init():
            bpp_acc[...] = jnp.zeros_like(bpp_acc)
            mse_acc[...] = jnp.zeros_like(mse_acc)
            if has_fea:
                fea_acc[...] = jnp.zeros_like(fea_acc)

        # ---- streamed lane-dense partial reductions (one tile per step) ----
        logsum = jnp.float32(0.0)
        for r in lik_refs:                       # padding is 1.0 -> log() == 0
            logsum = logsum + jnp.sum(jnp.log(r[...].astype(jnp.float32)))
        bpp_acc[...] += logsum * bpp_scale

        d = xhat_ref[...].astype(jnp.float32) - gt_ref[...].astype(jnp.float32)
        mse_acc[...] += jnp.sum(d * d) * mse_inv_n      # padding is 0 -> no-op

        if has_fea:
            df = y_ref[...].astype(jnp.float32) - ygt_ref[...].astype(jnp.float32)
            fea_part = (jnp.sum(jnp.abs(df)) if fea_l1
                        else jnp.sum(df * df)) * fea_inv_n
            if has_inter:
                di = (yi_ref[...].astype(jnp.float32)
                      - yigt_ref[...].astype(jnp.float32))
                fea_part = fea_part + (jnp.sum(jnp.abs(di)) if fea_l1
                                       else jnp.sum(di * di)) * inter_inv_n
            fea_acc[...] += fea_part

        # ---- epilogue: InfoNCE CE + all weighted scalar math, written once ----
        @pl.when(step == last)
        def _finish():
            out_ref[...] = jnp.zeros_like(out_ref)
            bpp = bpp_acc[...]                                   # (1, 1)
            mse = mse_acc[...]
            wmse = (lambda_metric * 255.0 * 255.0) * mse
            rd = bpp + wmse
            loss = rd
            out_ref[:, _O_BPP:_O_BPP + 1] = bpp
            out_ref[:, _O_MSE:_O_MSE + 1] = mse
            out_ref[:, _O_WMSE:_O_WMSE + 1] = wmse
            out_ref[:, _O_RD:_O_RD + 1] = rd
            if has_fea:
                fea = fea_acc[...]
                wfea = lambda_fea * fea
                loss = loss + wfea
                out_ref[:, _O_FEA:_O_FEA + 1] = fea
                out_ref[:, _O_WFEA:_O_WFEA + 1] = wfea
            if has_con:
                n_half = pa_ref.shape[0]
                inv_hw = 1.0 / float(con_hw)
                # adaptive_avg_pool2d((1,1)) == spatial mean, done in-kernel.
                pool_ref[0:n_half, :] = jnp.sum(
                    pa_ref[...].astype(jnp.float32), axis=2) * inv_hw
                pool_ref[n_half:2 * n_half, :] = jnp.sum(
                    pb_ref[...].astype(jnp.float32), axis=2) * inv_hw
                pooled = pool_ref[...]                            # (2N, C)
                sim = lax.dot_general(pooled, pooled,
                                      (((1,), (1,)), ((), ())),
                                      preferred_element_type=jnp.float32)
                n2 = 2 * n_half
                rows = lax.broadcasted_iota(jnp.int32, (n2, n2), 0)
                cols = lax.broadcasted_iota(jnp.int32, (n2, n2), 1)
                pair = (rows + n_half) % n2        # column of the positive view
                logits = sim * jnp.float32(1.0 / 0.07)
                pos = jnp.sum(jnp.where(cols == pair, logits, 0.0),
                              axis=1, keepdims=True)
                masked = jnp.where(cols == rows, jnp.float32(-1e30), logits)
                mmax = jnp.max(masked, axis=1, keepdims=True)
                lse = mmax + jnp.log(jnp.sum(jnp.exp(masked - mmax),
                                             axis=1, keepdims=True))
                con = jnp.mean(lse - pos, keepdims=True)          # (1,1) CE, tgt 0
                wcon = 0.5 * con
                loss = loss + wcon
                out_ref[:, _O_CON:_O_CON + 1] = con
                out_ref[:, _O_WCON:_O_WCON + 1] = wcon
            out_ref[:, _O_LOSS:_O_LOSS + 1] = loss

    return kernel, n_in


class Criterion:
    """Pallas-TPU port of the PyTorch Criterion (RateDistortion + Fea + Con)."""

    def __init__(self, opt):
        self.opt = opt
        self.criterion_metric = opt['network']['criterions']['criterion_metric']
        self.criterion_fea = opt['network']['criterions']['criterion_fea']
        self.lambda_metric = float(opt['network']['lambdas']['lambda_metric'])
        self.lambda_fea = float(opt['network']['lambdas']['lambda_fea'])
        # TODO(synk): 'ms-ssim' metric criterion has no Pallas port here; only 'mse'.
        assert self.criterion_metric == 'mse'
        if self.criterion_fea:
            assert self.criterion_fea in ('l1', 'l2')
        self._fwd = jax.jit(self._forward)

    def __call__(self, out_net, gt):
        return self._fwd(out_net, gt)

    def _forward(self, out_net, gt):
        N, _, H, W = gt.shape
        num_pixels = N * H * W
        bpp_scale = 1.0 / (-math.log(2.0) * num_pixels)

        lik_list = list(out_net['likelihoods'].values())
        n_lik = len(lik_list)
        x_hat = out_net['x_hat']
        assert x_hat.shape == gt.shape

        has_fea = bool(self.criterion_fea)
        fea_l1 = has_fea and self.criterion_fea == 'l1'
        has_inter = has_fea and ('y_inter' in out_net) and ('y_inter_gt' in out_net)
        has_con = ('y_noisy_project' in out_net) and ('y_ae_project' in out_net)

        # ---- shared lane-dense tiling plan for all streamed reductions ----
        tiled = [(lk, 1.0) for lk in lik_list]           # pad 1.0 -> log() == 0
        tiled += [(x_hat, 0.0), (gt, 0.0)]
        if has_fea:
            tiled += [(out_net['y'], 0.0), (out_net['y_gt'], 0.0)]
            if has_inter:
                tiled += [(out_net['y_inter'], 0.0), (out_net['y_inter_gt'], 0.0)]

        grid, rows_per_block = _plan_grid([a.size for a, _ in tiled])
        inputs = [_to_lane_tiles(a, pad, rpb, grid)
                  for (a, pad), rpb in zip(tiled, rows_per_block)]
        in_specs = [pl.BlockSpec((rpb, LANES), lambda g: (g, 0))
                    for rpb in rows_per_block]

        con_hw = 1
        if has_con:
            # Reference: ConLoss(fea_noisy_project=y_ae, fea_ae_project=y_noisy)
            # concatenates [y_noisy_project, y_ae_project]; pass as two refs.
            pa = out_net['y_noisy_project']
            pb = out_net['y_ae_project']
            assert pa.shape == pb.shape and pa.shape[0] == 16, \
                'info_nce_loss hardcodes 16 samples per view'
            nb, c, ph, pw = pa.shape
            con_hw = ph * pw
            inputs += [pa.reshape(nb, c, con_hw), pb.reshape(nb, c, con_hw)]
            proj_spec = pl.BlockSpec((nb, c, con_hw), lambda g: (0, 0, 0))
            in_specs += [proj_spec, proj_spec]

        kernel, n_in = _build_fused_kernel(
            n_lik=n_lik, bpp_scale=bpp_scale, mse_inv_n=1.0 / float(gt.size),
            has_fea=has_fea, fea_l1=fea_l1,
            fea_inv_n=(1.0 / float(out_net['y'].size)) if has_fea else 0.0,
            has_inter=has_inter,
            inter_inv_n=(1.0 / float(out_net['y_inter'].size)) if has_inter else 0.0,
            has_con=has_con, con_hw=con_hw,
            lambda_metric=self.lambda_metric, lambda_fea=self.lambda_fea)
        assert n_in == len(inputs)

        scratch = [pltpu.VMEM((1, 1), jnp.float32)
                   for _ in range(2 + (1 if has_fea else 0))]
        if has_con:
            scratch.append(pltpu.VMEM((2 * 16, out_net['y_ae_project'].shape[1]),
                                      jnp.float32))

        res = pl.pallas_call(
            kernel,
            out_shape=jax.ShapeDtypeStruct((1, LANES), jnp.float32),
            grid=(grid,),
            in_specs=in_specs,
            out_specs=pl.BlockSpec((1, LANES), lambda g: (0, 0)),
            scratch_shapes=scratch,
            compiler_params=pltpu.CompilerParams(
                dimension_semantics=("arbitrary",),
                vmem_limit_bytes=_VMEM_LIMIT_BYTES),
        )(*inputs)

        names = [('bpp_loss', _O_BPP), ('mse_loss', _O_MSE),
                 ('weighted_mse_loss', _O_WMSE), ('rd_loss', _O_RD)]
        if has_fea:
            names += [('fea_loss', _O_FEA), ('weighted_fea_loss', _O_WFEA)]
        if has_con:
            names += [('contrastive_loss', _O_CON), ('weighted_con_loss', _O_WCON)]
        names += [('loss', _O_LOSS)]

        out = {'loss': jnp.float32(0.0), 'rd_loss': jnp.float32(0.0),
               'contrastive_loss': jnp.float32(0.0)}
        for name, idx in names:
            out[name] = res[0, idx]
        return out


if __name__ == "__main__":
    key = jax.random.PRNGKey(0)
    ks = jax.random.split(key, 10)

    N, C_img, H, W = 2, 3, 16, 16          # image batch (NCHW)
    C_lat, h_lat, w_lat = 8, 4, 4          # latent features
    NCE_B = 16                             # hardcoded in info_nce_loss

    gt = jax.random.uniform(ks[0], (N, C_img, H, W), jnp.float32)
    x_hat = gt + 0.05 * jax.random.normal(ks[1], (N, C_img, H, W), jnp.float32)

    likelihood_y = jax.random.uniform(ks[2], (N, C_lat, h_lat, w_lat),
                                      jnp.float32, minval=0.1, maxval=1.0)
    likelihood_z = jax.random.uniform(ks[3], (N, C_lat, 2, 2),
                                      jnp.float32, minval=0.1, maxval=1.0)

    y = jax.random.normal(ks[4], (N, C_lat, h_lat, w_lat), jnp.float32)
    y_gt = y + 0.1 * jax.random.normal(ks[5], (N, C_lat, h_lat, w_lat), jnp.float32)

    y_ae_project = jax.random.normal(ks[6], (NCE_B, C_lat, h_lat, w_lat), jnp.float32)
    y_noisy_project = y_ae_project + 0.1 * jax.random.normal(
        ks[7], (NCE_B, C_lat, h_lat, w_lat), jnp.float32)

    out_net = {
        'likelihoods': {'y': likelihood_y, 'z': likelihood_z},
        'x_hat': x_hat,
        'y': y,
        'y_gt': y_gt,
        'y_noisy_project': y_noisy_project,
        'y_ae_project': y_ae_project,
    }

    opt = {'network': {'criterions': {'criterion_metric': 'mse',
                                      'criterion_fea': 'l2'},
                       'lambdas': {'lambda_metric': 0.01,
                                   'lambda_fea': 1.0}}}

    criterion = Criterion(opt)
    out = criterion(out_net, gt)
    jax.block_until_ready(out['loss'])
    print("KERNEL_OK")
</pallas_src>

<mosaic_0001>
module attributes {stable_mosaic.version = 11 : i64} {
  func.func @kernel(%arg0: i32, %arg1: memref<32x128xf32, #tpu.memory_space<vmem>>, %arg2: memref<32x128xf32, #tpu.memory_space<vmem>>, %arg3: memref<32x128xf32, #tpu.memory_space<vmem>>, %arg4: memref<32x128xf32, #tpu.memory_space<vmem>>, %arg5: memref<32x128xf32, #tpu.memory_space<vmem>>, %arg6: memref<32x128xf32, #tpu.memory_space<vmem>>, %arg7: memref<16x8x16xf32, #tpu.memory_space<vmem>>, %arg8: memref<16x8x16xf32, #tpu.memory_space<vmem>>, %arg9: memref<1x128xf32, #tpu.memory_space<vmem>>, %arg10: memref<1x1xf32, #tpu.memory_space<vmem>>, %arg11: memref<1x1xf32, #tpu.memory_space<vmem>>, %arg12: memref<1x1xf32, #tpu.memory_space<vmem>>, %arg13: memref<32x8xf32, #tpu.memory_space<vmem>>) attributes {dimension_semantics = [#tpu.dimension_semantics<arbitrary>], iteration_bounds = array<i64: 1>, scalar_prefetch = 0 : i64, scratch_operands = 4 : i64, tpu.core_type = #tpu.core_type<tc>, window_params = [{transform_indices = @transform_0, window_bounds = array<i64: 32, 128>}, {transform_indices = @transform_1, window_bounds = array<i64: 32, 128>}, {transform_indices = @transform_2, window_bounds = array<i64: 32, 128>}, {transform_indices = @transform_3, window_bounds = array<i64: 32, 128>}, {transform_indices = @transform_4, window_bounds = array<i64: 32, 128>}, {transform_indices = @transform_5, window_bounds = array<i64: 32, 128>}, {pipeline_mode = #tpu.pipeline_mode<synchronous>, transform_indices = @transform_6, window_bounds = array<i64: 16, 8, 16>}, {pipeline_mode = #tpu.pipeline_mode<synchronous>, transform_indices = @transform_7, window_bounds = array<i64: 16, 8, 16>}, {pipeline_mode = #tpu.pipeline_mode<synchronous>, transform_indices = @transform_8, window_bounds = array<i64: 1, 128>}]} {
    %c0_i32 = arith.constant 0 : i32
    %0 = arith.cmpi eq, %arg0, %c0_i32 : i32
    %1 = arith.extui %0 : i1 to i32
    %c0_i32_0 = arith.constant 0 : i32
    %2 = arith.cmpi ne, %1, %c0_i32_0 : i32
    scf.if %2 {
      %cst_33 = arith.constant 0.000000e+00 : f32
      %51 = vector.broadcast %cst_33 : f32 to vector<1x1xf32>
      %c0_34 = arith.constant 0 : index
      %c0_35 = arith.constant 0 : index
      %52 = vector.load %arg10[%c0_34, %c0_35] : memref<1x1xf32, #tpu.memory_space<vmem>>, vector<1x1xf32>
      tpu.vector_store %arg10[%c0_34, %c0_35], %51 {strides = array<i32>} : memref<1x1xf32, #tpu.memory_space<vmem>>, vector<1x1xf32>,
      %cst_36 = arith.constant 0.000000e+00 : f32
      %53 = vector.broadcast %cst_36 : f32 to vector<1x1xf32>
      %c0_37 = arith.constant 0 : index
      %c0_38 = arith.constant 0 : index
      %54 = vector.load %arg11[%c0_37, %c0_38] : memref<1x1xf32, #tpu.memory_space<vmem>>, vector<1x1xf32>
      tpu.vector_store %arg11[%c0_37, %c0_38], %53 {strides = array<i32>} : memref<1x1xf32, #tpu.memory_space<vmem>>, vector<1x1xf32>,
      %cst_39 = arith.constant 0.000000e+00 : f32
      %55 = vector.broadcast %cst_39 : f32 to vector<1x1xf32>
      %c0_40 = arith.constant 0 : index
      %c0_41 = arith.constant 0 : index
      %56 = vector.load %arg12[%c0_40, %c0_41] : memref<1x1xf32, #tpu.memory_space<vmem>>, vector<1x1xf32>
      tpu.vector_store %arg12[%c0_40, %c0_41], %55 {strides = array<i32>} : memref<1x1xf32, #tpu.memory_space<vmem>>, vector<1x1xf32>,
    } else {
    }
    %c0 = arith.constant 0 : index
    %c0_1 = arith.constant 0 : index
    %3 = vector.load %arg1[%c0, %c0_1] : memref<32x128xf32, #tpu.memory_space<vmem>>, vector<32x128xf32>
    %4 = math.log %3 : vector<32x128xf32>
    %5 = vector.shape_cast %4 : vector<32x128xf32> to vector<1x32x128xf32>
    %cst = arith.constant dense<0.000000e+00> : vector<1xf32>
    %6 = vector.multi_reduction <add>, %5, %cst [1, 2] : vector<1x32x128xf32> to vector<1xf32>
    %7 = vector.shape_cast %6 : vector<1xf32> to vector<1x1x1xf32>
    %8 = vector.extract %7[0, 0, 0] : f32 from vector<1x1x1xf32>
    %cst_2 = arith.constant 0.000000e+00 : f32
    %9 = arith.addf %cst_2, %8 : f32
    %c0_3 = arith.constant 0 : index
    %c0_4 = arith.constant 0 : index
    %10 = vector.load %arg2[%c0_3, %c0_4] : memref<32x128xf32, #tpu.memory_space<vmem>>, vector<32x128xf32>
    %11 = math.log %10 : vector<32x128xf32>
    %12 = vector.shape_cast %11 : vector<32x128xf32> to vector<1x32x128xf32>
    %cst_5 = arith.constant dense<0.000000e+00> : vector<1xf32>
    %13 = vector.multi_reduction <add>, %12, %cst_5 [1, 2] : vector<1x32x128xf32> to vector<1xf32>
    %14 = vector.shape_cast %13 : vector<1xf32> to vector<1x1x1xf32>
    %15 = vector.extract %14[0, 0, 0] : f32 from vector<1x1x1xf32>
    %16 = arith.addf %9, %15 : f32
    %c0_6 = arith.constant 0 : index
    %c0_7 = arith.constant 0 : index
    %17 = vector.load %arg10[%c0_6, %c0_7] : memref<1x1xf32, #tpu.memory_space<vmem>>, vector<1x1xf32>
    %cst_8 = arith.constant -0.00281776371 : f32
    %18 = arith.mulf %16, %cst_8 : f32
    %19 = vector.broadcast %18 : f32 to vector<1x1xf32>
    %20 = arith.addf %17, %19 : vector<1x1xf32>
    %c0_9 = arith.constant 0 : index
    %c0_10 = arith.constant 0 : index
    %21 = vector.load %arg10[%c0_9, %c0_10] : memref<1x1xf32, #tpu.memory_space<vmem>>, vector<1x1xf32>
    tpu.vector_store %arg10[%c0_9, %c0_10], %20 {strides = array<i32>} : memref<1x1xf32, #tpu.memory_space<vmem>>, vector<1x1xf32>,
    %c0_11 = arith.constant 0 : index
    %c0_12 = arith.constant 0 : index
    %22 = vector.load %arg3[%c0_11, %c0_12] : memref<32x128xf32, #tpu.memory_space<vmem>>, vector<32x128xf32>
    %c0_13 = arith.constant 0 : index
    %c0_14 = arith.constant 0 : index
    %23 = vector.load %arg4[%c0_13, %c0_14] : memref<32x128xf32, #tpu.memory_space<vmem>>, vector<32x128xf32>
    %24 = arith.subf %22, %23 : vector<32x128xf32>
    %c0_15 = arith.constant 0 : index
    %c0_16 = arith.constant 0 : index
    %25 = vector.load %arg11[%c0_15, %c0_16] : memref<1x1xf32, #tpu.memory_space<vmem>>, vector<1x1xf32>
    %26 = arith.mulf %24, %24 : vector<32x128xf32>
    %27 = vector.shape_cast %26 : vector<32x128xf32> to vector<1x32x128xf32>
    %cst_17 = arith.constant dense<0.000000e+00> : vector<1xf32>
    %28 = vector.multi_reduction <add>, %27, %cst_17 [1, 2] : vector<1x32x128xf32> to vector<1xf32>
    %29 = vector.shape_cast %28 : vector<1xf32> to vector<1x1x1xf32>
    %30 = vector.extract %29[0, 0, 0] : f32 from vector<1x1x1xf32>
    %cst_18 = arith.constant 6.51041686E-4 : f32
    %31 = arith.mulf %30, %cst_18 : f32
    %32 = vector.broadcast %31 : f32 to vector<1x1xf32>
    %33 = arith.addf %25, %32 : vector<1x1xf32>
    %c0_19 = arith.constant 0 : index
    %c0_20 = arith.constant 0 : index
    %34 = vector.load %arg11[%c0_19, %c0_20] : memref<1x1xf32, #tpu.memory_space<vmem>>, vector<1x1xf32>
    tpu.vector_store %arg11[%c0_19, %c0_20], %33 {strides = array<i32>} : memref<1x1xf32, #tpu.memory_space<vmem>>, vector<1x1xf32>,
    %c0_21 = arith.constant 0 : index
    %c0_22 = arith.constant 0 : index
    %35 = vector.load %arg5[%c0_21, %c0_22] : memref<32x128xf32, #tpu.memory_space<vmem>>, vector<32x128xf32>
    %c0_23 = arith.constant 0 : index
    %c0_24 = arith.constant 0 : index
    %36 = vector.load %arg6[%c0_23, %c0_24] : memref<32x128xf32, #tpu.memory_space<vmem>>, vector<32x128xf32>
    %37 = arith.subf %35, %36 : vector<32x128xf32>
    %38 = arith.mulf %37, %37 : vector<32x128xf32>
    %39 = vector.shape_cast %38 : vector<32x128xf32> to vector<1x32x128xf32>
    %cst_25 = arith.constant dense<0.000000e+00> : vector<1xf32>
    %40 = vector.multi_reduction <add>, %39, %cst_25 [1, 2] : vector<1x32x128xf32> to vector<1xf32>
    %41 = vector.shape_cast %40 : vector<1xf32> to vector<1x1x1xf32>
    %42 = vector.extract %41[0, 0, 0] : f32 from vector<1x1x1xf32>
    %cst_26 = arith.constant 3.906250e-03 : f32
    %43 = arith.mulf %42, %cst_26 : f32
    %c0_27 = arith.constant 0 : index
    %c0_28 = arith.constant 0 : index
    %44 = vector.load %arg12[%c0_27, %c0_28] : memref<1x1xf32, #tpu.memory_space<vmem>>, vector<1x1xf32>
    %45 = vector.broadcast %43 : f32 to vector<1x1xf32>
    %46 = arith.addf %44, %45 : vector<1x1xf32>
    %c0_29 = arith.constant 0 : index
    %c0_30 = arith.constant 0 : index
    %47 = vector.load %arg12[%c0_29, %c0_30] : memref<1x1xf32, #tpu.memory_space<vmem>>, vector<1x1xf32>
    tpu.vector_store %arg12[%c0_29, %c0_30], %46 {strides = array<i32>} : memref<1x1xf32, #tpu.memory_space<vmem>>, vector<1x1xf32>,
    %c0_i32_31 = arith.constant 0 : i32
    %48 = arith.cmpi eq, %arg0, %c0_i32_31 : i32
    %49 = arith.extui %48 : i1 to i32
    %c0_i32_32 = arith.constant 0 : i32
    %50 = arith.cmpi ne, %49, %c0_i32_32 : i32
    scf.if %50 {
      %cst_33 = arith.constant 0.000000e+00 : f32
      %51 = vector.broadcast %cst_33 : f32 to vector<1x128xf32>
      %c0_34 = arith.constant 0 : index
      %c0_35 = arith.constant 0 : index
      %52 = vector.load %arg9[%c0_34, %c0_35] : memref<1x128xf32, #tpu.memory_space<vmem>>, vector<1x128xf32>
      tpu.vector_store %arg9[%c0_34, %c0_35], %51 {strides = array<i32>} : memref<1x128xf32, #tpu.memory_space<vmem>>, vector<1x128xf32>,
      %c0_36 = arith.constant 0 : index
      %c0_37 = arith.constant 0 : index
      %53 = vector.load %arg10[%c0_36, %c0_37] : memref<1x1xf32, #tpu.memory_space<vmem>>, vector<1x1xf32>
      %c0_38 = arith.constant 0 : index
      %c0_39 = arith.constant 0 : index
      %54 = vector.load %arg11[%c0_38, %c0_39] : memref<1x1xf32, #tpu.memory_space<vmem>>, vector<1x1xf32>
      %cst_40 = arith.constant 6.502500e+02 : f32
      %55 = vector.broadcast %cst_40 : f32 to vector<1x1xf32>
      %56 = arith.mulf %55, %54 : vector<1x1xf32>
      %57 = arith.addf %53, %56 : vector<1x1xf32>
      %c0_41 = arith.constant 0 : index
      %c0_42 = arith.constant 0 : index
      %58 = vector.load %arg9[%c0_41, %c0_42] : memref<1x128xf32, #tpu.memory_space<vmem>>, vector<1x1xf32>
      tpu.vector_store %arg9[%c0_41, %c0_42], %53 {strides = array<i32>} : memref<1x128xf32, #tpu.memory_space<vmem>>, vector<1x1xf32>,
      %c0_43 = arith.constant 0 : index
      %c1 = arith.constant 1 : index
      %59 = vector.load %arg9[%c0_43, %c1] : memref<1x128xf32, #tpu.memory_space<vmem>>, vector<1x1xf32>
      tpu.vector_store %arg9[%c0_43, %c1], %54 {strides = array<i32>} : memref<1x128xf32, #tpu.memory_space<vmem>>, vector<1x1xf32>,
      %c0_44 = arith.constant 0 : index
      %c2 = arith.constant 2 : index
      %60 = vector.load %arg9[%c0_44, %c2] : memref<1x128xf32, #tpu.memory_space<vmem>>, vector<1x1xf32>
      tpu.vector_store %arg9[%c0_44, %c2], %56 {strides = array<i32>} : memref<1x128xf32, #tpu.memory_space<vmem>>, vector<1x1xf32>,
      %c0_45 = arith.constant 0 : index
      %c3 = arith.constant 3 : index
      %61 = vector.load %arg9[%c0_45, %c3] : memref<1x128xf32, #tpu.memory_space<vmem>>, vector<1x1xf32>
      tpu.vector_store %arg9[%c0_45, %c3], %57 {strides = array<i32>} : memref<1x128xf32, #tpu.memory_space<vmem>>, vector<1x1xf32>,
      %c0_46 = arith.constant 0 : index
      %c0_47 = arith.constant 0 : index
      %62 = vector.load %arg12[%c0_46, %c0_47] : memref<1x1xf32, #tpu.memory_space<vmem>>, vector<1x1xf32>
      %cst_48 = arith.constant 1.000000e+00 : f32
      %63 = vector.broadcast %cst_48 : f32 to vector<1x1xf32>
      %64 = arith.mulf %63, %62 : vector<1x1xf32>
      %65 = arith.addf %57, %64 : vector<1x1xf32>
      %c0_49 = arith.constant 0 : index
      %c4 = arith.constant 4 : index
      %66 = vector.load %arg9[%c0_49, %c4] : memref<1x128xf32, #tpu.memory_space<vmem>>, vector<1x1xf32>
      tpu.vector_store %arg9[%c0_49, %c4], %62 {strides = array<i32>} : memref<1x128xf32, #tpu.memory_space<vmem>>, vector<1x1xf32>,
      %c0_50 = arith.constant 0 : index
      %c5 = arith.constant 5 : index
      %67 = vector.load %arg9[%c0_50, %c5] : memref<1x128xf32, #tpu.memory_space<vmem>>, vector<1x1xf32>
      tpu.vector_store %arg9[%c0_50, %c5], %64 {strides = array<i32>} : memref<1x128xf32, #tpu.memory_space<vmem>>, vector<1x1xf32>,
      %c0_51 = arith.constant 0 : index
      %c0_52 = arith.constant 0 : index
      %c0_53 = arith.constant 0 : index
      %68 = vector.load %arg7[%c0_51, %c0_52, %c0_53] : memref<16x8x16xf32, #tpu.memory_space<vmem>>, vector<16x8x16xf32>
      %cst_54 = arith.constant dense<0.000000e+00> : vector<16x8xf32>
      %69 = vector.multi_reduction <add>, %68, %cst_54 [2] : vector<16x8x16xf32> to vector<16x8xf32>
      %cst_55 = arith.constant 6.250000e-02 : f32
      %70 = vector.broadcast %cst_55 : f32 to vector<16x8xf32>
      %71 = arith.mulf %69, %70 : vector<16x8xf32>
      %c0_56 = arith.constant 0 : index
      %c0_57 = arith.constant 0 : index
      %72 = vector.load %arg13[%c0_56, %c0_57] : memref<32x8xf32, #tpu.memory_space<vmem>>, vector<16x8xf32>
      tpu.vector_store %arg13[%c0_56, %c0_57], %71 {strides = array<i32>} : memref<32x8xf32, #tpu.memory_space<vmem>>, vector<16x8xf32>,
      %c0_58 = arith.constant 0 : index
      %c0_59 = arith.constant 0 : index
      %c0_60 = arith.constant 0 : index
      %73 = vector.load %arg8[%c0_58, %c0_59, %c0_60] : memref<16x8x16xf32, #tpu.memory_space<vmem>>, vector<16x8x16xf32>
      %cst_61 = arith.constant dense<0.000000e+00> : vector<16x8xf32>
      %74 = vector.multi_reduction <add>, %73, %cst_61 [2] : vector<16x8x16xf32> to vector<16x8xf32>
      %cst_62 = arith.constant 6.250000e-02 : f32
      %75 = vector.broadcast %cst_62 : f32 to vector<16x8xf32>
      %76 = arith.mulf %74, %75 : vector<16x8xf32>
      %c16 = arith.constant 16 : index
      %c0_63 = arith.constant 0 : index
      %77 = vector.load %arg13[%c16, %c0_63] : memref<32x8xf32, #tpu.memory_space<vmem>>, vector<16x8xf32>
      tpu.vector_store %arg13[%c16, %c0_63], %76 {strides = array<i32>} : memref<32x8xf32, #tpu.memory_space<vmem>>, vector<16x8xf32>,
      %c0_64 = arith.constant 0 : index
      %c0_65 = arith.constant 0 : index
      %78 = vector.load %arg13[%c0_64, %c0_65] : memref<32x8xf32, #tpu.memory_space<vmem>>, vector<32x8xf32>
      %cst_66 = arith.constant dense<0.000000e+00> : vector<32x32xf32>
      %79 = tpu.matmul %78, %78, %cst_66 {dimension_numbers = #tpu.dot_dimension_numbers<[1], [1], [0], [0], [0, 0, 1, 0], [], []>} : vector<32x8xf32>, vector<32x8xf32>, vector<32x32xf32> -> vector<32x32xf32>
      %80 = tpu.iota {dimensions = array<i32: 0>} : vector<32x32xi32>
      %81 = tpu.iota {dimensions = array<i32: 1>} : vector<32x32xi32>
      %c16_i32 = arith.constant 16 : i32
      %82 = vector.broadcast %c16_i32 : i32 to vector<32x32xi32>
      %83 = arith.addi %80, %82 : vector<32x32xi32>
      %c32_i32 = arith.constant 32 : i32
      %c0_i32_67 = arith.constant 0 : i32
      %84 = arith.cmpi eq, %c32_i32, %c0_i32_67 : i32
      %c1_i32 = arith.constant 1 : i32
      %85 = arith.select %84, %c1_i32, %c32_i32 : i32
      %86 = vector.broadcast %85 : i32 to vector<32x32xi32>
      %87 = arith.remsi %83, %86 : vector<32x32xi32>
      %c0_i32_68 = arith.constant 0 : i32
      %88 = vector.broadcast %c0_i32_68 : i32 to vector<32x32xi32>
      %89 = arith.cmpi ne, %87, %88 : vector<32x32xi32>
      %c0_i32_69 = arith.constant 0 : i32
      %90 = vector.broadcast %c0_i32_69 : i32 to vector<32x32xi32>
      %91 = arith.cmpi slt, %87, %90 : vector<32x32xi32>
      %c0_i32_70 = arith.constant 0 : i32
      %92 = arith.cmpi slt, %85, %c0_i32_70 : i32
      %93 = vector.broadcast %92 : i1 to vector<32x32xi1>
      %94 = vector.broadcast %93 : vector<32x32xi1> to vector<32x32xi1>
      %95 = arith.xori %91, %94 : vector<32x32xi1>
      %96 = arith.andi %95, %89 : vector<32x32xi1>
      %97 = vector.broadcast %85 : i32 to vector<32x32xi32>
      %98 = arith.addi %87, %97 : vector<32x32xi32>
      %99 = arith.select %96, %98, %87 : vector<32x32xi1>, vector<32x32xi32>
      %cst_71 = arith.constant 14.2857141 : f32
      %100 = vector.broadcast %cst_71 : f32 to vector<32x32xf32>
      %101 = arith.mulf %79, %100 : vector<32x32xf32>
      %102 = arith.cmpi eq, %81, %99 : vector<32x32xi32>
      %cst_72 = arith.constant 0.000000e+00 : f32
      %103 = vector.broadcast %cst_72 : f32 to vector<32x32xf32>
      %104 = arith.select %102, %101, %103 : vector<32x32xi1>, vector<32x32xf32>
      %cst_73 = arith.constant dense<0.000000e+00> : vector<32xf32>
      %105 = vector.multi_reduction <add>, %104, %cst_73 [1] : vector<32x32xf32> to vector<32xf32>
      %106 = vector.shape_cast %105 : vector<32xf32> to vector<32x1xf32>
      %107 = arith.cmpi eq, %81, %80 : vector<32x32xi32>
      %cst_74 = arith.constant -1.000000e+30 : f32
      %108 = vector.broadcast %cst_74 : f32 to vector<32x32xf32>
      %109 = arith.select %107, %108, %101 : vector<32x32xi1>, vector<32x32xf32>
      %cst_75 = arith.constant dense<0xFF800000> : vector<32xf32>
      %110 = vector.multi_reduction <maximumf>, %109, %cst_75 [1] : vector<32x32xf32> to vector<32xf32>
      %111 = vector.shape_cast %110 : vector<32xf32> to vector<32x1xf32>
      %112 = vector.broadcast %111 : vector<32x1xf32> to vector<32x32xf32>
      %113 = arith.subf %109, %112 : vector<32x32xf32>
      %114 = math.exp %113 : vector<32x32xf32>
      %cst_76 = arith.constant dense<0.000000e+00> : vector<32xf32>
      %115 = vector.multi_reduction <add>, %114, %cst_76 [1] : vector<32x32xf32> to vector<32xf32>
      %116 = vector.shape_cast %115 : vector<32xf32> to vector<32x1xf32>
      %117 = math.log %116 : vector<32x1xf32>
      %118 = arith.addf %111, %117 : vector<32x1xf32>
      %119 = arith.subf %118, %106 : vector<32x1xf32>
      %120 = vector.shape_cast %119 : vector<32x1xf32> to vector<1x32x1xf32>
      %cst_77 = arith.constant dense<0.000000e+00> : vector<1xf32>
      %121 = vector.multi_reduction <add>, %120, %cst_77 [1, 2] : vector<1x32x1xf32> to vector<1xf32>
      %122 = vector.shape_cast %121 : vector<1xf32> to vector<1x1x1xf32>
      %123 = vector.extract %122[0, 0, 0] : f32 from vector<1x1x1xf32>
      %124 = vector.broadcast %123 : f32 to vector<1x1xf32>
      %cst_78 = arith.constant 3.200000e+01 : f32
      %125 = vector.broadcast %cst_78 : f32 to vector<1x1xf32>
      %126 = arith.divf %124, %125 : vector<1x1xf32>
      %cst_79 = arith.constant 5.000000e-01 : f32
      %127 = vector.broadcast %cst_79 : f32 to vector<1x1xf32>
      %128 = arith.mulf %127, %126 : vector<1x1xf32>
      %129 = arith.addf %65, %128 : vector<1x1xf32>
      %c0_80 = arith.constant 0 : index
      %c6 = arith.constant 6 : index
      %130 = vector.load %arg9[%c0_80, %c6] : memref<1x128xf32, #tpu.memory_space<vmem>>, vector<1x1xf32>
      tpu.vector_store %arg9[%c0_80, %c6], %126 {strides = array<i32>} : memref<1x128xf32, #tpu.memory_space<vmem>>, vector<1x1xf32>,
      %c0_81 = arith.constant 0 : index
      %c7 = arith.constant 7 : index
      %131 = vector.load %arg9[%c0_81, %c7] : memref<1x128xf32, #tpu.memory_space<vmem>>, vector<1x1xf32>
      tpu.vector_store %arg9[%c0_81, %c7], %128 {strides = array<i32>} : memref<1x128xf32, #tpu.memory_space<vmem>>, vector<1x1xf32>,
      %c0_82 = arith.constant 0 : index
      %c8 = arith.constant 8 : index
      %132 = vector.load %arg9[%c0_82, %c8] : memref<1x128xf32, #tpu.memory_space<vmem>>, vector<1x1xf32>
      tpu.vector_store %arg9[%c0_82, %c8], %129 {strides = array<i32>} : memref<1x128xf32, #tpu.memory_space<vmem>>, vector<1x1xf32>,
    } else {
    }
    return
  }
  func.func @transform_0(%arg0: i32) -> (i32, i32) {
    %c0_i32 = arith.constant 0 : i32
    %c0_i32_0 = arith.constant 0 : i32
    return %arg0, %c0_i32 : i32, i32
  }
  func.func @transform_1(%arg0: i32) -> (i32, i32) {
    %c0_i32 = arith.constant 0 : i32
    %c0_i32_0 = arith.constant 0 : i32
    return %arg0, %c0_i32 : i32, i32
  }
  func.func @transform_2(%arg0: i32) -> (i32, i32) {
    %c0_i32 = arith.constant 0 : i32
    %c0_i32_0 = arith.constant 0 : i32
    return %arg0, %c0_i32 : i32, i32
  }
  func.func @transform_3(%arg0: i32) -> (i32, i32) {
    %c0_i32 = arith.constant 0 : i32
    %c0_i32_0 = arith.constant 0 : i32
    return %arg0, %c0_i32 : i32, i32
  }
  func.func @transform_4(%arg0: i32) -> (i32, i32) {
    %c0_i32 = arith.constant 0 : i32
    %c0_i32_0 = arith.constant 0 : i32
    return %arg0, %c0_i32 : i32, i32
  }
  func.func @transform_5(%arg0: i32) -> (i32, i32) {
    %c0_i32 = arith.constant 0 : i32
    %c0_i32_0 = arith.constant 0 : i32
    return %arg0, %c0_i32 : i32, i32
  }
  func.func @transform_6(%arg0: i32) -> (i32, i32, i32) {
    %c0_i32 = arith.constant 0 : i32
    %c0_i32_0 = arith.constant 0 : i32
    %c0_i32_1 = arith.constant 0 : i32
    %c0_i32_2 = arith.constant 0 : i32
    return %c0_i32, %c0_i32_0, %c0_i32_1 : i32, i32, i32
  }
  func.func @transform_7(%arg0: i32) -> (i32, i32, i32) {
    %c0_i32 = arith.constant 0 : i32
    %c0_i32_0 = arith.constant 0 : i32
    %c0_i32_1 = arith.constant 0 : i32
    %c0_i32_2 = arith.constant 0 : i32
    return %c0_i32, %c0_i32_0, %c0_i32_1 : i32, i32, i32
  }
  func.func @transform_8(%arg0: i32) -> (i32, i32) {
    %c0_i32 = arith.constant 0 : i32
    %c0_i32_0 = arith.constant 0 : i32
    %c0_i32_1 = arith.constant 0 : i32
    return %c0_i32, %c0_i32_0 : i32, i32
  }
}

</mosaic_0001>

<bundles_post_ra>
// kernel: _forward.1
= control target key start
LH: loop header
LB: loop body
LE: loop exit
PB: predicated region body
PF: predicated region fallthrough
CT: control target
= control target key end

     0   :  { %vm231_vm0 = vcmask 130048   ;;  %vm378_vm1 = vcmask 1041409   ;;  %vm380_vm2 = vcmask 1042434   ;;  %vm382_vm3 = vcmask 1043459   ;;  %s953_s27 = smov 2   ;;  %s954_s28 = smov 3   ;;  %s1446_s7 = inlined_call_operand.vmem [shape: f32[16,8,16], index: 7, kind: input, shape index: {}]   ;;  %s1447_s6 = inlined_call_operand.vmem [shape: f32[16,8,16], index: 6, kind: input, shape index: {}]   ;;  %s1448_s0 = inlined_call_operand.vmem [shape: f32[32,128], index: 0, kind: input, shape index: {}]   ;;  %s1449_s1 = inlined_call_operand.vmem [shape: f32[32,128], index: 1, kind: input, shape index: {}]   ;;  %s1450_s4 = inlined_call_operand.vmem [shape: f32[32,128], index: 4, kind: input, shape index: {}]   ;;  %s1451_s5 = inlined_call_operand.vmem [shape: f32[32,128], index: 5, kind: input, shape index: {}]   ;;  %s1452_s2 = inlined_call_operand.vmem [shape: f32[32,128], index: 2, kind: input, shape index: {}]   ;;  %s1453_s3 = inlined_call_operand.vmem [shape: f32[32,128], index: 3, kind: input, shape index: {}]   ;;  %s1454_s8 = inlined_call_operand.vmem [shape: f32[1,128], index: 8, kind: output, shape index: {}]  }
   0x1   :  { %v414_v0 = vld [vmem:[%s1446_s7 + $0x50] sm:$0xff]  ;;  %v412_v1 = vld [vmem:[%s1446_s7 + $0x40] sm:$0xff]  ;;  %v415_v2 = vld [vmem:[%s1446_s7 + $0x58] sm:$0xff]  ;;  %vm384_vm4 = vcmask 1044484   ;;  %vm386_vm5 = vcmask 1045509   ;;  %vm388_vm6 = vcmask 1046534  }
   0x2   :  { %v450_v3 = vsel %vm231_vm0, %v414_v0, 0.0  ;;  %v444_v4 = vsel %vm231_vm0, %v412_v1, 0.0  ;;  %v413_v5 = vld [vmem:[%s1446_s7 + $0x48] sm:$0xff]  ;;  %v453_v6 = vsel %vm231_vm0, %v415_v2, 0.0  ;;  %v416_v8 = vld [vmem:[%s1446_s7 + $0x60] sm:$0xff]  ;;  %v406_v16 = vld [vmem:[%s1446_s7 + $0x10] sm:$0xff]  ;;  %v169_v0 = vlaneseq }
   0x3   :  { %451 = vadd.xlane.f32.xlu1 %v450_v3  ;;  %445 = vadd.xlane.f32.xlu0 %v444_v4  ;;  %v447_v7 = vsel %vm231_vm0, %v413_v5, 0.0  ;;  %v404_v9 = vld [vmem:[%s1446_s7] sm:$0xff]  ;;  %v456_v10 = vsel %vm231_vm0, %v416_v8, 0.0  ;;  %v405_v12 = vld [vmem:[%s1446_s7 + $0x8] sm:$0xff]  ;;  %v418_v17 = vld [vmem:[%s1446_s7 + $0x70] sm:$0xff]  ;;  %v426_v18 = vsel %vm231_vm0, %v406_v16, 0.0 }
   0x4   :  { %v420_v11 = vsel %vm231_vm0, %v404_v9, 0.0  ;;  %v417_v13 = vld [vmem:[%s1446_s7 + $0x68] sm:$0xff]  ;;  %v423_v14 = vsel %vm231_vm0, %v405_v12, 0.0  ;;  %v462_v19 = vsel %vm231_vm0, %v418_v17, 0.0  ;;  %v407_v20 = vld [vmem:[%s1446_s7 + $0x18] sm:$0xff]  ;;  %v408_v24 = vld [vmem:[%s1446_s7 + $0x20] sm:$0xff] }
   0x5   :  { %v459_v15 = vsel %vm231_vm0, %v417_v13, 0.0  ;;  %v419_v21 = vld [vmem:[%s1446_s7 + $0x78] sm:$0xff]  ;;  %v429_v22 = vsel %vm231_vm0, %v407_v20, 0.0  ;;  %v223_v25 = vld [vmem:[%s1447_s6 + $0x40] sm:$0xff]  ;;  %v432_v26 = vsel %vm231_vm0, %v408_v24, 0.0  ;;  %v224_v28 = vld [vmem:[%s1447_s6 + $0x48] sm:$0xff] }
   0x6   :  { %v465_v23 = vsel %vm231_vm0, %v419_v21, 0.0  ;;  %v256_v27 = vsel %vm231_vm0, %v223_v25, 0.0  ;;  %v409_v29 = vld [vmem:[%s1446_s7 + $0x28] sm:$0xff]  ;;  %v259_v30 = vsel %vm231_vm0, %v224_v28, 0.0  ;;  %v225_v32 = vld [vmem:[%s1447_s6 + $0x50] sm:$0xff]  ;;  %v226_v36 = vld [vmem:[%s1447_s6 + $0x58] sm:$0xff] }
   0x7   :  { %454 = vadd.xlane.f32.xlu1 %v453_v6  ;;  %448 = vadd.xlane.f32.xlu0 %v447_v7  ;;  %v435_v31 = vsel %vm231_vm0, %v409_v29, 0.0  ;;  %v410_v33 = vld [vmem:[%s1446_s7 + $0x30] sm:$0xff]  ;;  %v262_v34 = vsel %vm231_vm0, %v225_v32, 0.0  ;;  %v411_v37 = vld [vmem:[%s1446_s7 + $0x38] sm:$0xff]  ;;  %v265_v38 = vsel %vm231_vm0, %v226_v36, 0.0  ;;  %v227_v40 = vld [vmem:[%s1447_s6 + $0x60] sm:$0xff] }
   0x8   :  { %v438_v35 = vsel %vm231_vm0, %v410_v33, 0.0  ;;  %v441_v39 = vsel %vm231_vm0, %v411_v37, 0.0  ;;  %v215_v41 = vld [vmem:[%s1447_s6] sm:$0xff]  ;;  %v268_v42 = vsel %vm231_vm0, %v227_v40, 0.0  ;;  %v216_v44 = vld [vmem:[%s1447_s6 + $0x8] sm:$0xff]  ;;  %v217_v48 = vld [vmem:[%s1447_s6 + $0x10] sm:$0xff] }
   0x9   :  { %v232_v43 = vsel %vm231_vm0, %v215_v41, 0.0  ;;  %v228_v45 = vld [vmem:[%s1447_s6 + $0x68] sm:$0xff]  ;;  %v235_v46 = vsel %vm231_vm0, %v216_v44, 0.0  ;;  %v229_v49 = vld [vmem:[%s1447_s6 + $0x70] sm:$0xff]  ;;  %v238_v50 = vsel %vm231_vm0, %v217_v48, 0.0  ;;  %v218_v52 = vld [vmem:[%s1447_s6 + $0x18] sm:$0xff] }
   0xa   :  { %v271_v47 = vsel %vm231_vm0, %v228_v45, 0.0  ;;  %v274_v51 = vsel %vm231_vm0, %v229_v49, 0.0  ;;  %v230_v53 = vld [vmem:[%s1447_s6 + $0x78] sm:$0xff]  ;;  %v241_v54 = vsel %vm231_vm0, %v218_v52, 0.0  ;;  %v219_v56 = vld [vmem:[%s1447_s6 + $0x20] sm:$0xff]  ;;  %v220_v57 = vld [vmem:[%s1447_s6 + $0x28] sm:$0xff] }
   0xb   :  { %457 = vadd.xlane.f32.xlu0 %v456_v10  ;;  %421 = vadd.xlane.f32.xlu1 %v420_v11  ;;  %v277_v55 = vsel %vm231_vm0, %v230_v53, 0.0  ;;  %v244_v58 = vsel %vm231_vm0, %v219_v56, 0.0  ;;  %v247_v59 = vsel %vm231_vm0, %v220_v57, 0.0  ;;  %v221_v60 = vld [vmem:[%s1447_s6 + $0x30] sm:$0xff]  ;;  %v222_v61 = vld [vmem:[%s1447_s6 + $0x38] sm:$0xff]  ;;  %v1131_v3 = vshrl.u32 %v169_v0, 7 }
   0xc   :  { %v250_v62 = vsel %vm231_vm0, %v221_v60, 0.0  ;;  %v253_v63 = vsel %vm231_vm0, %v222_v61, 0.0  ;;  %v1133_v4 = vand.u32 127, %v169_v0  ;;  %vm390_vm7 = vcmask 1047559   ;;  %s952_s7 = smov 1   ;;  %s955_s29 = smov 4  }
   0xd   :  { %vm401_vm8 = vcmask 64512   ;;  %vm751_vm11 = vcmask 261120   ;;  %s956_s30 = smov 5  }
   0xe   :  { %v1137_v8 = vsub.s32 %v1133_v4, %v1131_v3  ;;  %vm764_vm13 = vcmp.eq.s32.totalorder %v1133_v4, %v1131_v3 }
   0xf   :  { %424 = vadd.xlane.f32.xlu0 %v423_v14  ;;  %460 = vadd.xlane.f32.xlu1 %v459_v15 }
  0x13   :  { %427 = vadd.xlane.f32.xlu0 %v426_v18  ;;  %463 = vadd.xlane.f32.xlu1 %v462_v19 }
  0x17   :  { %430 = vadd.xlane.f32.xlu0 %v429_v22  ;;  %466 = vadd.xlane.f32.xlu1 %v465_v23 }
  0x1b   :  { %433 = vadd.xlane.f32.xlu0 %v432_v26  ;;  %257 = vadd.xlane.f32.xlu1 %v256_v27 }
  0x1f   :  { %260 = vadd.xlane.f32.xlu0 %v259_v30  ;;  %436 = vadd.xlane.f32.xlu1 %v435_v31 }
  0x23   :  { %263 = vadd.xlane.f32.xlu0 %v262_v34  ;;  %439 = vadd.xlane.f32.xlu1 %v438_v35 }
  0x27   :  { %266 = vadd.xlane.f32.xlu0 %v265_v38  ;;  %442 = vadd.xlane.f32.xlu1 %v441_v39 }
  0x2b   :  { %269 = vadd.xlane.f32.xlu0 %v268_v42  ;;  %233 = vadd.xlane.f32.xlu1 %v232_v43 }
  0x2f   :  { %236 = vadd.xlane.f32.xlu0 %v235_v46  ;;  %272 = vadd.xlane.f32.xlu1 %v271_v47 }
  0x33   :  { %239 = vadd.xlane.f32.xlu0 %v238_v50  ;;  %275 = vadd.xlane.f32.xlu1 %v274_v51 }
  0x37   :  { %242 = vadd.xlane.f32.xlu0 %v241_v54  ;;  %278 = vadd.xlane.f32.xlu1 %v277_v55 }
  0x3b   :  { %245 = vadd.xlane.f32.xlu0 %v244_v58  ;;  %248 = vadd.xlane.f32.xlu1 %v247_v59 }
  0x3f   :  { %251 = vadd.xlane.f32.xlu0 %v250_v62  ;;  %254 = vadd.xlane.f32.xlu1 %v253_v63 }
  0x8c   :  { %v452_v1 = vpop.xlane.xlu1 %451  ;;  %v446_v2 = vpop.xlane.xlu0 %445 }
  0x8d   :  { %v476_v9 = vmul.f32 0.0625, %v446_v2  ;;  %v478_v13 = vmul.f32 0.0625, %v452_v1 }
  0x8f   :  { %v535_v14 = vrot.slane %v476_v9, %v1137_v8  ;;  %v543_v19 = vrot.slane %v478_v13, %v1137_v8 }
  0x90   :  { %v455_v5 = vpop.xlane.xlu1 %454  ;;  %v449_v6 = vpop.xlane.xlu0 %448 }
  0x91   :  { %v477_v7 = vmul.f32 0.0625, %v449_v6  ;;  %v479_v15 = vmul.f32 0.0625, %v455_v5 }
  0x93   :  { %v539_v12 = vrot.slane %v477_v7, %v1137_v8  ;;  %v547_v21 = vrot.slane %v479_v15, %v1137_v8 }
  0x94   :  { %v458_v10 = vpop.xlane.xlu0 %457  ;;  %v422_v11 = vpop.xlane.xlu1 %421 }
  0x95   :  { %v571_v18 = vsel %vm378_vm1, %v539_v12, %v535_v14  ;;  %v480_v20 = vmul.f32 0.0625, %v458_v10  ;;  %v468_v45 = vmul.f32 0.0625, %v422_v11 }
  0x96   :  { %v572_v23 = vsel %vm380_vm2, %v543_v19, %v571_v18 }
  0x97   :  { %v551_v27 = vrot.slane %v480_v20, %v1137_v8  ;;  %v573_v28 = vsel %vm382_vm3, %v547_v21, %v572_v23  ;;  %v503_v53 = vrot.slane %v468_v45, %v1137_v8 }
  0x98   :  { %v425_v16 = vpop.xlane.xlu0 %424  ;;  %v461_v17 = vpop.xlane.xlu1 %460 }
  0x99   :  { %v481_v22 = vmul.f32 0.0625, %v461_v17  ;;  %v574_v34 = vsel %vm384_vm4, %v551_v27, %v573_v28  ;;  %v469_v41 = vmul.f32 0.0625, %v425_v16 }
  0x9b   :  { %v555_v29 = vrot.slane %v481_v22, %v1137_v8  ;;  %v507_v48 = vrot.slane %v469_v41, %v1137_v8 }
  0x9c   :  { %v428_v24 = vpop.xlane.xlu0 %427  ;;  %v464_v25 = vpop.xlane.xlu1 %463 }
  0x9d   :  { %v482_v26 = vmul.f32 0.0625, %v464_v25  ;;  %v575_v35 = vsel %vm386_vm5, %v555_v29, %v574_v34  ;;  %v470_v42 = vmul.f32 0.0625, %v428_v24  ;;  %v564_v58 = vsel %vm378_vm1, %v507_v48, %v503_v53 }
  0x9f   :  { %v559_v30 = vrot.slane %v482_v26, %v1137_v8  ;;  %v511_v50 = vrot.slane %v470_v42, %v1137_v8 }
  0xa0   :  { %v431_v31 = vpop.xlane.xlu0 %430  ;;  %v467_v32 = vpop.xlane.xlu1 %466 }
  0xa1   :  { %v483_v33 = vmul.f32 0.0625, %v467_v32  ;;  %v576_v37 = vsel %vm388_vm6, %v559_v30, %v575_v35  ;;  %v471_v46 = vmul.f32 0.0625, %v431_v31  ;;  %v565_v60 = vsel %vm380_vm2, %v511_v50, %v564_v58 }
  0xa3   :  { %v563_v36 = vrot.slane %v483_v33, %v1137_v8  ;;  %v515_v54 = vrot.slane %v471_v46, %v1137_v8 }
  0xa4   :  { %v434_v38 = vpop.xlane.xlu0 %433  ;;  %v258_v39 = vpop.xlane.xlu1 %257 }
  0xa5   :  { %v577_v40 = vsel %vm390_vm7, %v563_v36, %v576_v37  ;;  %v472_v47 = vmul.f32 0.0625, %v434_v38  ;;  %v566_v0 = vsel %vm382_vm3, %v515_v54, %v565_v60  ;;  %v288_v16 = vmul.f32 0.0625, %v258_v39 }
  0xa6   :  { %581 = vst.msk [vmem:[#allocation5 + $0x18] sm:$0xff] %vm401_vm8, %v577_v40 }
  0xa7   :  { %v519_v57 = vrot.slane %v472_v47, %v1137_v8  ;;  %v349_v24 = vrot.slane %v288_v16, %v1137_v8 }
  0xa8   :  { %v261_v43 = vpop.xlane.xlu0 %260  ;;  %v437_v44 = vpop.xlane.xlu1 %436 }
  0xa9   :  { %v473_v49 = vmul.f32 0.0625, %v437_v44  ;;  %v567_v2 = vsel %vm384_vm4, %v519_v57, %v566_v0  ;;  %v289_v12 = vmul.f32 0.0625, %v261_v43 }
  0xab   :  { %v523_v59 = vrot.slane %v473_v49, %v1137_v8  ;;  %v353_v19 = vrot.slane %v289_v12, %v1137_v8  ;;  %v686_v12 = vadd.s32 16, %v1131_v3 }
  0xac   :  { %v264_v51 = vpop.xlane.xlu0 %263  ;;  %v440_v52 = vpop.xlane.xlu1 %439 }
  0xad   :  { %v474_v55 = vmul.f32 0.0625, %v440_v52  ;;  %v1159_v56 = vld [vmem:[#allocation5 + $0x18] sm:$0xff]  ;;  %v568_v5 = vsel %vm386_vm5, %v523_v59, %v567_v2  ;;  %v290_v13 = vmul.f32 0.0625, %v264_v51  ;;  %v392_v30 = vsel %vm378_vm1, %v353_v19, %v349_v24 }
  0xae   :  { %880 = vmatprep.subr.msk.mxu0 %vm401_vm8, %v1159_v56  ;;  %894 = vmatprep.subr.msk.mxu1 %vm401_vm8, %v1159_v56  ;;  %v689_v16 = vadd.s32 16, %v686_v12  ;;  %vm766_vm0 = vcmp.eq.s32.totalorder %v1133_v4, %v686_v12 }
  0xaf   :  { %881 = vmatpush3.xpose.msk.msra.mxu0 %vm401_vm8, %v1159_v56  ;;  %898 = vmatpush3.xpose.msk.msra.mxu1 %vm401_vm8, %v1159_v56  ;;  %v527_v61 = vrot.slane %v474_v55, %v1137_v8  ;;  %v357_v21 = vrot.slane %v290_v13, %v1137_v8 }
  0xb0   :  { %v267_v62 = vpop.xlane.xlu0 %266  ;;  %v443_v63 = vpop.xlane.xlu1 %442 }
  0xb1   :  { %v475_v1 = vmul.f32 0.0625, %v443_v63  ;;  %v569_v7 = vsel %vm388_vm6, %v527_v61, %v568_v5  ;;  %v291_v17 = vmul.f32 0.0625, %v267_v62  ;;  %v393_v33 = vsel %vm380_vm2, %v357_v21, %v392_v30 }
  0xb3   :  { %v531_v6 = vrot.slane %v475_v1, %v1137_v8  ;;  %v361_v25 = vrot.slane %v291_v17, %v1137_v8  ;;  %v695_v17 = vand.u32 31, %v686_v12 }
  0xb4   :  { %v270_v9 = vpop.xlane.xlu0 %269  ;;  %v234_v10 = vpop.xlane.xlu1 %233 }
  0xb5   :  { %v570_v11 = vsel %vm390_vm7, %v531_v6, %v569_v7  ;;  %v292_v18 = vmul.f32 0.0625, %v270_v9  ;;  %v280_v34 = vmul.f32 0.0625, %v234_v10  ;;  %v394_v38 = vsel %vm382_vm3, %v361_v25, %v393_v33 }
  0xb6   :  { %580 = vst.msk [vmem:[#allocation5 + $0x10] sm:$0xff] %vm401_vm8, %v570_v11  ;;  %v687_v11 = vadd.s32 24, %v1131_v3  ;;  %vm1247_vm14 = vcmp.eq.s32.totalorder %v1133_v4, %v695_v17 }
  0xb7   :  { %v365_v28 = vrot.slane %v292_v18, %v1137_v8  ;;  %v317_v46 = vrot.slane %v280_v34, %v1137_v8 }
  0xb8   :  { %v237_v14 = vpop.xlane.xlu0 %236  ;;  %v273_v15 = vpop.xlane.xlu1 %272  ;;  %vm767_vm12 = vcmp.eq.s32.totalorder %v1133_v4, %v687_v11 }
  0xb9   :  { %v293_v20 = vmul.f32 0.0625, %v273_v15  ;;  %v281_v29 = vmul.f32 0.0625, %v237_v14  ;;  %v395_v41 = vsel %vm384_vm4, %v365_v28, %v394_v38  ;;  %v690_v14 = vadd.s32 16, %v687_v11 }
  0xbb   :  { %v369_v31 = vrot.slane %v293_v20, %v1137_v8  ;;  %v321_v42 = vrot.slane %v281_v29, %v1137_v8  ;;  %v716_v18 = vand.u32 31, %v690_v14  ;;  %v97_v14 = vld [vmem:[%s1453_s3] sm:$0xff] }
  0xbc   :  { %v240_v22 = vpop.xlane.xlu0 %239  ;;  %v276_v23 = vpop.xlane.xlu1 %275 }
  0xbd   :  { %v294_v26 = vmul.f32 0.0625, %v276_v23  ;;  %v584_v27 = vld [vmem:[#allocation5 + $0x10] sm:$0xff]  ;;  %v282_v32 = vmul.f32 0.0625, %v240_v22  ;;  %v396_v43 = vsel %vm386_vm5, %v369_v31, %v395_v41  ;;  %v379_v54 = vsel %vm378_vm1, %v321_v42, %v317_v46  ;;  %v37_v42 = vld [vmem:[%s1448_s0] sm:$0xff] }
  0xbe   :  { %882 = vmatprep.subr.msk.mxu0 %vm401_vm8, %v584_v27  ;;  %895 = vmatprep.subr.msk.mxu1 %vm401_vm8, %v584_v27  ;;  %vm1252_vm15 = vcmp.eq.s32.totalorder %v1133_v4, %v716_v18  ;;  %919 = vlog2.f32 %v37_v42  ;;  %v95_v42 = vld [vmem:[%s1452_s2 + $0x10] sm:$0xff] }
  0xbf   :  { %891 = vmatprep.mubr.msk.f32.mxu1 %vm401_vm8, %v584_v27  ;;  %883 = vmatpush3.xpose.msk.msra.mxu0 %vm401_vm8, %v584_v27  ;;  %v373_v35 = vrot.slane %v294_v26, %v1137_v8  ;;  %v325_v44 = vrot.slane %v282_v32, %v1137_v8 }
  0xc0   :  { %899 = vmatpush3.xpose.msk.msra.mxu1 %vm401_vm8, %v584_v27  ;;  %v243_v36 = vpop.xlane.xlu0 %242  ;;  %v279_v37 = vpop.xlane.xlu1 %278 }
  0xc1   :  { %v283_v39 = vmul.f32 0.0625, %v243_v36  ;;  %v295_v40 = vmul.f32 0.0625, %v279_v37  ;;  %v397_v47 = vsel %vm388_vm6, %v373_v35, %v396_v43  ;;  %v381_v55 = vsel %vm380_vm2, %v325_v44, %v379_v54  ;;  %v38_v43 = vld [vmem:[%s1448_s0 + $0x8] sm:$0xff] }
  0xc2   :  { %921 = vlog2.f32 %v38_v43  ;;  %v99_v43 = vld [vmem:[%s1453_s3 + $0x10] sm:$0xff]  ;;  %vm33_vm2 = vcmask 0  }
  0xc3   :  { %v377_v45 = vrot.slane %v295_v40, %v1137_v8  ;;  %v329_v48 = vrot.slane %v283_v39, %v1137_v8 }
  0xc4   :  { %v246_v49 = vpop.xlane.xlu0 %245  ;;  %v249_v50 = vpop.xlane.xlu1 %248 }
  0xc5   :  { %v398_v51 = vsel %vm390_vm7, %v377_v45, %v397_v47  ;;  %v284_v52 = vmul.f32 0.0625, %v246_v49  ;;  %v285_v53 = vmul.f32 0.0625, %v249_v50  ;;  %v383_v58 = vsel %vm382_vm3, %v329_v48, %v381_v55  ;;  %v62_v45 = vld [vmem:[%s1449_s1] sm:$0xff]  ;;  %v63_v47 = vld [vmem:[%s1449_s1 + $0x8] sm:$0xff]  ;;  %v39_v55 = vld [vmem:[%s1448_s0 + $0x10] sm:$0xff] }
  0xc6   :  { %403 = vst.msk [vmem:[#allocation5 + $0x8] sm:$0xff] %vm401_vm8, %v398_v51  ;;  %v64_v51 = vld [vmem:[%s1449_s1 + $0x10] sm:$0xff]  ;;  %923 = vlog2.f32 %v62_v45  ;;  %vm824_vm3 = vcmask 7168  }
  0xc7   :  { %v333_v57 = vrot.slane %v284_v52, %v1137_v8  ;;  %v337_v59 = vrot.slane %v285_v53, %v1137_v8  ;;  %925 = vlog2.f32 %v63_v47  ;;  %v129_v47 = vld [vmem:[%s1450_s4 + $0x18] sm:$0xff] }
  0xc8   :  { %v252_v60 = vpop.xlane.xlu0 %251  ;;  %v255_v61 = vpop.xlane.xlu1 %254 }
  0xc9   :  { %v385_v62 = vsel %vm384_vm4, %v333_v57, %v383_v58  ;;  %v286_v63 = vmul.f32 0.0625, %v252_v60  ;;  %v287_v0 = vmul.f32 0.0625, %v255_v61  ;;  %v65_v61 = vld [vmem:[%s1449_s1 + $0x18] sm:$0xff]  ;;  %vm176_vm4 = vcmask 8200  }
  0xca   :  { %v387_v5 = vsel %vm386_vm5, %v337_v59, %v385_v62  ;;  %v40_v62 = vld [vmem:[%s1448_s0 + $0x18] sm:$0xff]  ;;  %vm186_vm5 = vcmask 16400  }
  0xcb   :  { %v341_v1 = vrot.slane %v286_v63, %v1137_v8  ;;  %v345_v2 = vrot.slane %v287_v0, %v1137_v8  ;;  %v685_v8 = vadd.s32 8, %v1131_v3  ;;  %v920_v63 = vpop.eup %919 }
  0xcd   :  { %v389_v6 = vsel %vm388_vm6, %v341_v1, %v387_v5  ;;  %v583_v7 = vld [vmem:[#allocation5 + $0x8] sm:$0xff]  ;;  %v688_v13 = vadd.s32 16, %v685_v8  ;;  %vm765_vm9 = vcmp.eq.s32.totalorder %v1133_v4, %v685_v8  ;;  %v93_v8 = vld [vmem:[%s1452_s2] sm:$0xff]  ;;  %vm196_vm6 = vcmask 24600  }
  0xce   :  { %v391_v9 = vsel %vm390_vm7, %v345_v2, %v389_v6  ;;  %884 = vmatprep.subr.msk.mxu0 %vm401_vm8, %v583_v7  ;;  %896 = vmatprep.subr.msk.mxu1 %vm401_vm8, %v583_v7  ;;  %v126_v2 = vld [vmem:[%s1450_s4] sm:$0xff]  ;;  %v127_v6 = vld [vmem:[%s1450_s4 + $0x8] sm:$0xff]  ;;  %vm208_vm7 = vcmask 32800  }
  0xcf   :  { %402 = vst.msk [vmem:[#allocation5] sm:$0xff] %vm401_vm8, %v391_v9  ;;  %885 = vmatpush3.xpose.msk.msra.mxu0 %vm401_vm8, %v583_v7  ;;  %900 = vmatpush3.xpose.msk.msra.mxu1 %vm401_vm8, %v583_v7  ;;  %v702_v15 = vand.u32 31, %v688_v13  ;;  %v922_v0 = vpop.eup %921  ;;  %v131_v9 = vld [vmem:[%s1451_s5 + $0x8] sm:$0xff] }
  0xd0   :  { %v94_v13 = vld [vmem:[%s1452_s2 + $0x8] sm:$0xff] }
  0xd1   :  { %vm1235_vm10 = vcmp.eq.s32.totalorder %v1133_v4, %v702_v15  ;;  %v98_v15 = vld [vmem:[%s1453_s3 + $0x8] sm:$0xff] }
  0xd3   :  { %v924_v1 = vpop.eup %923 }
  0xd4   :  { %v926_v5 = vpop.eup %925  ;;  %v67_v17 = vmul.f32 0.6931472, %v924_v1 }
  0xd5   :  { %v69_v18 = vmul.f32 0.6931472, %v926_v5 }
  0xd6   :  { %v582_v10 = vld [vmem:[#allocation5] sm:$0xff] }
  0xd7   :  { %886 = vmatprep.subr.msk.mxu0 %vm401_vm8, %v582_v10  ;;  %897 = vmatprep.subr.msk.mxu1 %vm401_vm8, %v582_v10 }
  0xd8   :  { %888 = vmatprep.mubr.msk.f32.mxu0 %vm401_vm8, %v582_v10  ;;  %887 = vmatpush3.xpose.msk.msra.mxu0 %vm401_vm8, %v582_v10 }
  0xd9   :  { %901 = vmatpush3.xpose.msk.msra.mxu1 %vm401_vm8, %v582_v10 }
  0xdb   :  { %889 = vmatmul.mubr.msk.f32.vlgmr.msra.gmra.mxu0 %vm401_vm8, %v583_v7  ;;  %v130_v7 = vld [vmem:[%s1451_s5] sm:$0xff] }
  0xdc   :  { %892 = vmatmul.mubr.msk.f32.vlgmr.msra.gmra.mxu1 %vm401_vm8, %v1159_v56  ;;  %v709_v56 = vand.u32 31, %v689_v16  ;;  %vm213_vm8 = vcmask 41000  }
  0xde   :  { %vm1267_vm1 = vcmp.eq.s32.totalorder %v1133_v4, %v709_v56  ;;  %v135_v56 = vsub.f32 %v127_v6, %v131_v9 }
 0x19b   :  { %v890_v19 = vpop.f32.mrf.mxu0 }
 0x19c   :  { %v1239_v21 = vmul.f32 14.285714, %v890_v19  ;;  %v893_v22 = vpop.f32.mrf.mxu1  ;;  %v134_v19 = vsub.f32 %v126_v2, %v130_v7 }
 0x19d   :  { %v1242_v23 = vmul.f32 14.285714, %v893_v22  ;;  %v664_v24 = vpop.f32.mrf.mxu0 }
 0x19e   :  { %v1256_v27 = vmul.f32 14.285714, %v664_v24  ;;  %v674_v28 = vpop.f32.mrf.mxu1  ;;  %v769_v29 = vsel %vm765_vm9, -1e+30, %v1239_v21  ;;  %v748_v30 = vsel %vm1235_vm10, %v1239_v21, 0.0  ;;  %vm846_vm9 = vcmask 49200  }
 0x19f   :  { %v1262_v31 = vmul.f32 14.285714, %v674_v28  ;;  %v775_v32 = vsel %vm751_vm11, %v769_v29, -inf  ;;  %v771_v35 = vsel %vm767_vm12, -1e+30, %v1242_v23  ;;  %v750_v37 = vsel %vm1252_vm15, %v1242_v23, 0.0 }
 0x1a0   :  { %776 = vmax.xlane.f32.xlu1 %v775_v32  ;;  %v768_v34 = vsel %vm764_vm13, -1e+30, %v1256_v27  ;;  %v747_v36 = vsel %vm1247_vm14, %v1256_v27, 0.0  ;;  %v781_v4 = vsel %vm751_vm11, %v771_v35, -inf  ;;  %v128_v28 = vld [vmem:[%s1450_s4 + $0x10] sm:$0xff]  ;;  %v755_v2 = vsel %vm751_vm11, %v748_v30, 0.0 }
 0x1a1   :  { %v772_v38 = vsel %vm751_vm11, %v768_v34, -inf  ;;  %v770_v39 = vsel %vm766_vm0, -1e+30, %v1262_v31  ;;  %v749_v40 = vsel %vm1267_vm1, %v1262_v31, 0.0  ;;  %v761_v30 = vsel %vm751_vm11, %v750_v37, 0.0 }
 0x1a2   :  { %773 = vmax.xlane.f32.xlu0 %v772_v38  ;;  %v778_v41 = vsel %vm751_vm11, %v770_v39, -inf  ;;  %v101_v38 = vsub.f32 %v93_v8, %v97_v14  ;;  %v752_v8 = vsel %vm751_vm11, %v747_v36, 0.0  ;;  %v758_v27 = vsel %vm751_vm11, %v749_v40, 0.0 }
 0x1a3   :  { %v951_v37 = vmov 0.0   ;;  %vm848_vm10 = vcmask 57400  }
 0x1a4   :  { %782 = vmax.xlane.f32.xlu1 %v781_v4  ;;  %34 = vst.msk [vmem:[#allocation2] sm:$0x1] %vm33_vm2, %v951_v37  ;;  %35 = vst.msk [vmem:[#allocation3] sm:$0x1] %vm33_vm2, %v951_v37 }
 0x1a5   :  { %36 = vst.msk [vmem:[#allocation4] sm:$0x1] %vm33_vm2, %v951_v37  ;;  %162 = vst [vmem:[%s1454_s8] sm:$0x1] %v951_v37  ;;  %v171_v37 = vsub.s32 0, %v1131_v3 }
 0x1a6   :  { %779 = vmax.xlane.f32.xlu0 %v778_v41 }
 0x229   :  { %v1294_v44 = vpop.xlane.xlu1 %776 }
 0x22a   :  { %v785_v46 = vsub.f32 %v769_v29, %v1294_v44  ;;  %v132_v29 = vld [vmem:[%s1451_s5 + $0x10] sm:$0xff] }
 0x22b   :  { %v1303_v48 = vpop.xlane.xlu0 %773 }
 0x22c   :  { %v790_v49 = vmul.f32 1.442695, %v785_v46  ;;  %v784_v50 = vsub.f32 %v768_v34, %v1303_v48  ;;  %v42_v34 = vmul.f32 0.6931472, %v920_v63  ;;  %v74_v46 = vadd.f32 %v69_v18, %v67_v17 }
 0x22d   :  { %v1309_v52 = vpop.xlane.xlu1 %782  ;;  %v106_v63 = vmul.f32 %v101_v38, %v101_v38 }
 0x22e   :  { %927 = vpow2.f32 %v790_v49  ;;  %v788_v53 = vmul.f32 1.442695, %v784_v50  ;;  %v787_v54 = vsub.f32 %v771_v35, %v1309_v52  ;;  %v44_v35 = vmul.f32 0.6931472, %v922_v0  ;;  %v133_v49 = vld [vmem:[%s1451_s5 + $0x18] sm:$0xff] }
 0x22f   :  { %v1315_v57 = vpop.xlane.xlu0 %779  ;;  %929 = vlog2.f32 %v64_v51  ;;  %v136_v50 = vsub.f32 %v128_v28, %v132_v29  ;;  %v138_v51 = vmul.f32 %v134_v19, %v134_v19  ;;  %v137_v5 = vsub.f32 %v129_v47, %v133_v49 }
 0x230   :  { %931 = vpow2.f32 %v788_v53  ;;  %v794_v58 = vmul.f32 1.442695, %v787_v54  ;;  %v786_v59 = vsub.f32 %v770_v39, %v1315_v57  ;;  %v102_v39 = vsub.f32 %v94_v13, %v98_v15 }
 0x231   :  { %933 = vlog2.f32 %v39_v55  ;;  %v139_v53 = vmul.f32 %v135_v56, %v135_v56  ;;  %v140_v9 = vmul.f32 %v136_v50, %v136_v50  ;;  %v141_v15 = vmul.f32 %v137_v5, %v137_v5 }
 0x232   :  { %935 = vpow2.f32 %v794_v58  ;;  %v792_v60 = vmul.f32 1.442695, %v786_v59  ;;  %v49_v59 = vadd.f32 %v44_v35, %v42_v34  ;;  %v107_v0 = vmul.f32 %v102_v39, %v102_v39 }
 0x234   :  { %937 = vpow2.f32 %v792_v60  ;;  %v96_v60 = vld [vmem:[%s1452_s2 + $0x18] sm:$0xff]  ;;  %v110_v21 = vadd.f32 %v107_v0, %v106_v63 }
 0x235   :  { %939 = vlog2.f32 %v65_v61  ;;  %v100_v61 = vld [vmem:[%s1453_s3 + $0x18] sm:$0xff] }
 0x236   :  { %941 = vlog2.f32 %v40_v62  ;;  %v103_v62 = vsub.f32 %v95_v42, %v99_v43 }
 0x238   :  { %v108_v13 = vmul.f32 %v103_v62, %v103_v62 }
 0x23a   :  { %v111_v17 = vadd.f32 %v110_v21, %v108_v13 }
 0x23b   :  { %v928_v10 = vpop.eup %927 }
 0x23c   :  { %v930_v11 = vpop.eup %929  ;;  %v799_v12 = vsel %vm751_vm11, %v928_v10, 0.0  ;;  %v142_v10 = vadd.f32 %v139_v53, %v138_v51 }
 0x23d   :  { %v932_v16 = vpop.eup %931  ;;  %800 = vadd.xlane.f32.xlu1 %v799_v12  ;;  %v71_v41 = vmul.f32 0.6931472, %v930_v11  ;;  %v104_v11 = vsub.f32 %v96_v60, %v100_v61 }
 0x23e   :  { %v934_v22 = vpop.eup %933  ;;  %v796_v24 = vsel %vm751_vm11, %v932_v16, 0.0  ;;  %v143_v25 = vadd.f32 %v142_v10, %v140_v9 }
 0x23f   :  { %v936_v32 = vpop.eup %935  ;;  %797 = vadd.xlane.f32.xlu0 %v796_v24  ;;  %v46_v58 = vmul.f32 0.6931472, %v934_v22  ;;  %v75_v7 = vadd.f32 %v74_v46, %v71_v41  ;;  %v109_v16 = vmul.f32 %v104_v11, %v104_v11 }
 0x240   :  { %v805_v4 = vsel %vm751_vm11, %v936_v32, 0.0  ;;  %v144_v26 = vadd.f32 %v143_v25, %v141_v15 }
 0x241   :  { %v938_v45 = vpop.eup %937  ;;  %806 = vadd.xlane.f32.xlu1 %v805_v4  ;;  %v50_v20 = vadd.f32 %v49_v59, %v46_v58  ;;  %v112_v23 = vadd.f32 %v111_v17, %v109_v16  ;;  %v87_v17 = vld [vmem:[#allocation2] sm:$0x1] }
 0x242   :  { %v940_v54 = vpop.eup %939  ;;  %v802_v55 = vsel %vm751_vm11, %v938_v45, 0.0  ;;  %vm858_vm11 = vcmask 65600  }
 0x243   :  { %803 = vadd.xlane.f32.xlu0 %v802_v55  ;;  %v942_v1 = vpop.eup %941  ;;  %v73_v6 = vmul.f32 0.6931472, %v940_v54 }
 0x244   :  { %v48_v12 = vmul.f32 0.6931472, %v942_v1 }
 0x245   :  { %756 = vadd.xlane.f32.xlu1 %v755_v2  ;;  %v76_v14 = vadd.f32 %v75_v7, %v73_v6 }
 0x246   :  { %v51_v36 = vadd.f32 %v50_v20, %v48_v12 }
 0x247   :  { %753 = vadd.xlane.f32.xlu0 %v752_v8 }
 0x249   :  { %762 = vadd.xlane.f32.xlu1 %v761_v30 }
 0x24b   :  { %759 = vadd.xlane.f32.xlu0 %v758_v27 }
 0x24d   :  { %77 = vadd.xlane.f32.xlu1 %v76_v14 }
 0x24f   :  { %52 = vadd.xlane.f32.xlu0 %v51_v36 }
 0x251   :  { %145 = vadd.xlane.f32.xlu1 %v144_v26  ;;  %v105_v26 = vld [vmem:[#allocation3] sm:$0x1] }
 0x253   :  { %113 = vadd.xlane.f32.xlu0 %v112_v23 }
 0x2c6   :  { %v801_v31 = vpop.xlane.xlu1 %800 }
 0x2c7   :  { %943 = vlog2.f32 %v801_v31  ;;  %v155_v31 = vld [vmem:[#allocation4] sm:$0x1] }
 0x2c8   :  { %v798_v33 = vpop.xlane.xlu0 %797 }
 0x2c9   :  { %945 = vlog2.f32 %v798_v33 }
 0x2ca   :  { %v807_v40 = vpop.xlane.xlu1 %806 }
 0x2cb   :  { %947 = vlog2.f32 %v807_v40 }
 0x2cc   :  { %v804_v18 = vpop.xlane.xlu0 %803 }
 0x2cd   :  { %949 = vlog2.f32 %v804_v18 }
 0x2ce   :  { %v757_v19 = vpop.xlane.xlu1 %756 }
 0x2d0   :  { %v754_v56 = vpop.xlane.xlu0 %753 }
 0x2d2   :  { %v763_v22 = vpop.xlane.xlu1 %762 }
 0x2d4   :  { %v944_v24 = vpop.eup %943  ;;  %v760_v28 = vpop.xlane.xlu0 %759 }
 0x2d5   :  { %v811_v29 = vmul.f32 0.6931472, %v944_v24 }
 0x2d6   :  { %v946_v32 = vpop.eup %945  ;;  %v78_v34 = vpop.xlane.xlu1 %77 }
 0x2d7   :  { %v809_v35 = vmul.f32 0.6931472, %v946_v32  ;;  %v817_v38 = vadd.f32 %v811_v29, %v1294_v44  ;;  %v79_v39 = vrot.slane %v78_v34, 4 }
 0x2d8   :  { %v948_v4 = vpop.eup %947  ;;  %v53_v41 = vpop.xlane.xlu0 %52 }
 0x2d9   :  { %v815_v42 = vmul.f32 0.6931472, %v948_v4  ;;  %v816_v43 = vadd.f32 %v809_v35, %v1303_v48  ;;  %v54_v45 = vrot.slane %v53_v41, 4  ;;  %v80_v47 = vadd.f32 %v79_v39, %v78_v34 }
 0x2da   :  { %v950_v46 = vpop.eup %949  ;;  %v146_v49 = vpop.xlane.xlu1 %145  ;;  %v821_v51 = vsub.f32 %v817_v38, %v757_v19 }
 0x2db   :  { %v813_v50 = vmul.f32 0.6931472, %v950_v46  ;;  %v820_v53 = vsub.f32 %v816_v43, %v754_v56  ;;  %v819_v54 = vadd.f32 %v815_v42, %v1309_v52  ;;  %v55_v55 = vadd.f32 %v54_v45, %v53_v41 }
 0x2dc   :  { %v81_v58 = vrot.slane %v80_v47, 2  ;;  %v114_v59 = vpop.xlane.xlu0 %113  ;;  %v147_v44 = vrot.slane %v146_v49, 4  ;;  %v826_v1 = vsel %vm824_vm3, %v821_v51, 0.0 }
 0x2dd   :  { %v825_v60 = vsel %vm824_vm3, %v820_v53, 0.0  ;;  %v818_v61 = vadd.f32 %v813_v50, %v1315_v57  ;;  %v115_v62 = vrot.slane %v114_v59, 4  ;;  %v56_v48 = vrot.slane %v55_v55, 2 }
 0x2de   :  { %v148_v63 = vadd.f32 %v147_v44, %v146_v49  ;;  %v82_v0 = vadd.f32 %v81_v58, %v80_v47  ;;  %v823_v2 = vsub.f32 %v819_v54, %v763_v22  ;;  %v827_v7 = vadd.f32 %v826_v1, %v825_v60 }
 0x2df   :  { %v822_v5 = vsub.f32 %v818_v61, %v760_v28  ;;  %v116_v6 = vadd.f32 %v115_v62, %v114_v59  ;;  %v57_v9 = vadd.f32 %v56_v48, %v55_v55 }
 0x2e0   :  { %v149_v52 = vrot.slane %v148_v63, 2  ;;  %v83_v10 = vrot.slane %v82_v0, 1  ;;  %v830_v57 = vsel %vm824_vm3, %v823_v2, 0.0 }
 0x2e1   :  { %v828_v8 = vsel %vm824_vm3, %v822_v5, 0.0  ;;  %v117_v11 = vrot.slane %v116_v6, 2  ;;  %v58_v20 = vrot.slane %v57_v9, 1 }
 0x2e2   :  { %v829_v12 = vadd.f32 %v828_v8, %v827_v7  ;;  %v150_v13 = vadd.f32 %v149_v52, %v148_v63  ;;  %v84_v21 = vadd.f32 %v83_v10, %v82_v0 }
 0x2e3   :  { %v118_v30 = vadd.f32 %v117_v11, %v116_v6  ;;  %v59_v15 = vadd.f32 %v58_v20, %v57_v9 }
 0x2e4   :  { %v831_v14 = vadd.f32 %v830_v57, %v829_v12  ;;  %v151_v25 = vrot.slane %v150_v13, 1 }
 0x2e5   :  { %v119_v27 = vrot.slane %v118_v30, 1  ;;  %902 = vpush %v59_v15 }
 0x2e6   :  { %832 = vadd.xlane.f32.xlu0 %v831_v14  ;;  %v152_v36 = vadd.f32 %v151_v25, %v150_v13  ;;  %904 = vpush %v84_v21 }
 0x2e7   :  { %v120_v16 = vadd.f32 %v119_v27, %v118_v30 }
 0x2e9   :  { %906 = vpush %v120_v16 }
 0x2ea   :  { %908 = vpush %v152_v36 }
 0x316   :  { %s903_s4 = spop %902 }
 0x317   :  { %s905_s5 = spop %904 }
 0x318   :  { %s86_s21 = sadd.f32 %s905_s5, %s903_s4  ;;  %s957_s4 = smov 8  }
 0x31a   :  { %s907_s0 = spop %906  ;;  %s88_s22 = smul.f32 -0.0028177637, %s86_s21 }
 0x31b   :  { %s909_s23 = spop %908  ;;  %s122_s6 = smul.f32 0.0006510417, %s907_s0 }
 0x31c   :  { %v89_v23 = vstv %s88_s22  ;;  %s154_s24 = smul.f32 0.00390625, %s909_s23 }
 0x31d   :  { %v90_v33 = vadd.f32 %v89_v23, %v87_v17  ;;  %v123_v40 = vstv %s122_s6 }
 0x31e   :  { %v124_v18 = vadd.f32 %v123_v40, %v105_v26  ;;  %v156_v19 = vstv %s154_s24 }
 0x31f   :  { %92 = vst.msk [vmem:[#allocation2] sm:$0x1] %vm33_vm2, %v90_v33  ;;  %v157_v56 = vadd.f32 %v156_v19, %v155_v31 }
 0x320   :  { %125 = vst.msk [vmem:[#allocation3] sm:$0x1] %vm33_vm2, %v124_v18 }
 0x321   :  { %158 = vst.msk [vmem:[#allocation4] sm:$0x1] %vm33_vm2, %v157_v56 }
 0x326   :  { %v163_v22 = vld [vmem:[#allocation2] sm:$0x1] }
 0x327   :  { %v164_v24 = vld [vmem:[#allocation3] sm:$0x1]  ;;  %167 = vst.msk [vmem:[%s1454_s8] sm:$0x1] %vm33_vm2, %v163_v22 }
 0x328   :  { %v172_v28 = vrot.slane %v164_v24, %v171_v37  ;;  %v165_v29 = vmul.f32 650.25, %v164_v24  ;;  %v198_v35 = vld [vmem:[#allocation4] sm:$0x1] }
 0x329   :  { %v204_v3 = vrot.slane %v198_v35, %v171_v37 }
 0x32a   :  { %173 = vrot.lane.b32.xlu1 %v172_v28, %s952_s7  ;;  %v166_v32 = vadd.f32 %v165_v29, %v163_v22  ;;  %v182_v34 = vrot.slane %v165_v29, %v171_v37 }
 0x32c   :  { %v192_v38 = vrot.slane %v166_v32, %v171_v37  ;;  %183 = vrot.lane.b32.xlu0 %v182_v34, %s953_s27  ;;  %v199_v39 = vadd.f32 %v198_v35, %v166_v32 }
 0x32e   :  { %193 = vrot.lane.b32.xlu1 %v192_v38, %s954_s28 }
 0x332   :  { %205 = vrot.lane.b32.xlu1 %v204_v3, %s955_s29 }
 0x336   :  { %210 = vrot.lane.b32.xlu1 %v204_v3, %s956_s30 }
 0x36f   :  { %v833_v4 = vpop.xlane.xlu0 %832 }
 0x370   :  { %v834_v41 = vrot.slane %v833_v4, 4 }
 0x372   :  { %v835_v42 = vadd.f32 %v834_v41, %v833_v4 }
 0x374   :  { %v836_v43 = vrot.slane %v835_v42, 2 }
 0x376   :  { %v837_v45 = vadd.f32 %v836_v43, %v835_v42 }
 0x378   :  { %v838_v46 = vrot.slane %v837_v45, 1 }
 0x37a   :  { %v839_v47 = vadd.f32 %v838_v46, %v837_v45 }
 0x37c   :  { %910 = vpush %v839_v47 }
 0x39c   :  { %v174_v49 = vpop.permute.xlu1 %173 }
 0x39d   :  { %177 = vst.msk [vmem:[%s1454_s8] sm:$0x1] %vm176_vm4, %v174_v49 }
 0x39e   :  { %v184_v50 = vpop.permute.xlu0 %183 }
 0x39f   :  { %187 = vst.msk [vmem:[%s1454_s8] sm:$0x1] %vm186_vm5, %v184_v50 }
 0x3a0   :  { %v194_v51 = vpop.permute.xlu1 %193 }
 0x3a1   :  { %197 = vst.msk [vmem:[%s1454_s8] sm:$0x1] %vm196_vm6, %v194_v51 }
 0x3a4   :  { %v206_v53 = vpop.permute.xlu1 %205 }
 0x3a5   :  { %209 = vst.msk [vmem:[%s1454_s8] sm:$0x1] %vm208_vm7, %v206_v53 }
 0x3a8   :  { %v211_v54 = vpop.permute.xlu1 %210 }
 0x3a9   :  { %214 = vst.msk [vmem:[%s1454_s8] sm:$0x1] %vm213_vm8, %v211_v54 }
 0x3ad   :  { %s911_s19 = spop %910 }
 0x3ae   :  { %v841_v55 = vstv %s911_s19 }
 0x3af   :  { %v843_v58 = vmul.f32 0.03125, %v841_v55 }
 0x3b1   :  { %v844_v59 = vmul.f32 0.5, %v843_v58  ;;  %847 = vst.msk [vmem:[%s1454_s8] sm:$0x1] %vm846_vm9, %v843_v58 }
 0x3b3   :  { %v845_v44 = vadd.f32 %v844_v59, %v199_v39  ;;  %849 = vst.msk [vmem:[%s1454_s8] sm:$0x1] %vm848_vm10, %v844_v59 }
 0x3b5   :  { %v854_v60 = vrot.slane %v845_v44, %v171_v37 }
 0x3b7   :  { %855 = vrot.lane.b32.xlu0 %v854_v60, %s957_s4 }
 0x429   :  { %v856_v61 = vpop.permute.xlu0 %855 }
 0x42a   :  { %859 = vst.msk [vmem:[%s1454_s8] sm:$0x1] %vm858_vm11, %v856_v61 }

</bundles_post_ra>
